<compile_context>
chip_gen: v7x
topology: tpu7x:2x2x1
jax: 0.10.0
libtpu: 0.0.40
codegen_flags: <defaults>
</compile_context>

<pallas_src>
import math

import jax
import jax.numpy as jnp
from jax.experimental import pallas as pl
from jax.experimental.pallas import tpu as pltpu

_EPS = 1e-12  # matches F.normalize default eps


def make_arcface_kernel(s, m, easy_margin):
    cos_m = math.cos(m)
    sin_m = math.sin(m)
    th = math.cos(math.pi - m)
    mm = math.sin(math.pi - m) * m
    inv_s = 1.0 / s

    def arcface_kernel(x_ref, w_ref, label_ref, out_ref):
        # x_ref:     (tb, in)  bf16, L2-normalized AND pre-scaled by s in the wrapper
        # w_ref:     (in, tn)  bf16, L2-normalized columns (pre-transposed in wrapper)
        # label_ref: (tb, 1)   int32 class index per row (-1 on padded rows)
        # out_ref:   (tb, tn)  s-scaled logits
        tb, tn = out_ref.shape

        # --- s*cosine = (s * x_norm) @ w_norm  (bf16 operands, f32 MXU accumulate) ---
        s_cos = jax.lax.dot_general(
            x_ref[...], w_ref[...],
            dimension_numbers=(((1,), (0,)), ((), ())),
            preferred_element_type=jnp.float32)            # (tb, tn) f32

        # --- per-row target mask for this class tile (local column index) ---
        # grid axis 0 is the class-tile axis.
        local_label = label_ref[...] - pl.program_id(0) * tn      # (tb, 1)
        col = jax.lax.broadcasted_iota(jnp.int32, (tb, tn), 1)
        mask = col == local_label                                 # (tb, tn) bool

        # --- arc margin only on the gathered target logit (B-sized work) ---
        # If a row's label falls outside this tile, the sentinel -2*s is gathered;
        # the clip keeps sqrt NaN-free and the final where never selects phi there.
        s_cos_y = jnp.max(jnp.where(mask, s_cos, -2.0 * s), axis=-1, keepdims=True)
        cos_y = s_cos_y * inv_s
        sin_y = jnp.sqrt(jnp.clip(1.0 - cos_y * cos_y, 0.0, 1.0))
        phi_y = cos_y * cos_m - sin_y * sin_m
        if easy_margin:
            phi_y = jnp.where(cos_y > 0.0, phi_y, cos_y)
        else:
            phi_y = jnp.where(cos_y > th, phi_y, cos_y - mm)
        s_phi_y = phi_y * s                                       # (tb, 1)

        out_ref[...] = jnp.where(mask, s_phi_y, s_cos).astype(out_ref.dtype)

    return arcface_kernel


def _round_up(a, b):
    return (a + b - 1) // b * b


def _vmem_budget():
    """(tile budget bytes, vmem_limit_bytes) — generous on 128 MiB parts, safe on v7x."""
    cap = None
    try:
        info = pltpu.get_tpu_info()
        cap = getattr(info, "vmem_capacity_bytes", None)
    except Exception:
        cap = None
    if cap is not None and cap >= 96 * 1024 * 1024:
        # v5e / v6e: 128 MiB physical VMEM -> bigger tiles, fewer grid-step overheads.
        return 80 * 1024 * 1024, 96 * 1024 * 1024
    # v7x (64 MiB physical / 32 MiB scoped default) or unknown: stay conservative.
    return 24 * 1024 * 1024, 32 * 1024 * 1024


def _footprint_bytes(tb, tn, in_features):
    """Double-buffered VMEM footprint estimate (layout-padded)."""
    in_lane = _round_up(in_features, 128)          # x last dim, lane-padded
    in_sub = _round_up(in_features, 16)            # w 2nd-last dim, bf16 sublane-packed
    tb_sub = _round_up(tb, 16)
    w_buf = 2 * in_sub * tn * 2                    # bf16 normalized weight
    x_buf = 2 * tb_sub * in_lane * 2               # bf16 normalized, s-scaled x
    lbl_buf = 2 * _round_up(tb, 8) * 128 * 4       # int32 labels (lane-padded)
    out_buf = 2 * _round_up(tb, 8) * tn * 4        # f32 output tile
    return w_buf + x_buf + lbl_buf + out_buf


def arcface_forward(x, weight, label, *, s=64.0, m=0.2, easy_margin=False,
                    max_tile_n=2048, max_tile_b=512, out_dtype=jnp.float32):
    B, in_features = x.shape
    out_features, in_w = weight.shape
    assert in_features == in_w

    # --- normalize x once, fold the *s scale in (exact for power-of-2 s), bf16 ---
    x32 = x.astype(jnp.float32)
    x_n = x32 * jax.lax.rsqrt(
        jnp.maximum(jnp.sum(x32 * x32, axis=-1, keepdims=True), _EPS * _EPS))
    x_bf = (x_n * s).astype(jnp.bfloat16)

    # --- normalize W rows once, transpose to (in, N), bf16 for the MXU ---
    w32 = weight.astype(jnp.float32)
    w_n = w32 * jax.lax.rsqrt(
        jnp.maximum(jnp.sum(w32 * w32, axis=-1, keepdims=True), _EPS * _EPS))
    w_t = jnp.transpose(w_n).astype(jnp.bfloat16)              # (in, N)

    label2d = label.reshape(B, 1).astype(jnp.int32)

    budget, vmem_limit = _vmem_budget()

    # --- tile sizes ---
    tb = B if B <= max_tile_b else max_tile_b                  # max_tile_b: mult of 16
    tn = min(max_tile_n, _round_up(out_features, 128))
    while tn > 128 and _footprint_bytes(tb, tn, in_features) > budget:
        tn -= 128
    if B > max_tile_b:
        while tb > 16 and _footprint_bytes(tb, tn, in_features) > budget:
            tb //= 2
    b_pad = B if tb == B else _round_up(B, tb)
    n_pad = _round_up(out_features, tn)

    # --- pad to tile multiples (zero weight cols -> zero logits, sliced off;
    #     padded rows get label -1 so they never take the margin branch) ---
    if n_pad != out_features:
        w_t = jnp.pad(w_t, ((0, 0), (0, n_pad - out_features)))
    if b_pad != B:
        x_bf = jnp.pad(x_bf, ((0, b_pad - B), (0, 0)))
        label2d = jnp.pad(label2d, ((0, b_pad - B), (0, 0)), constant_values=-1)

    # Class axis OUTER so each W tile is fetched once and stays resident across all
    # inner batch steps; batch axis marked "arbitrary" so a megacore split (v7x)
    # lands on the class axis.
    grid = (n_pad // tn, b_pad // tb)
    kernel = make_arcface_kernel(s, m, easy_margin)

    out = pl.pallas_call(
        kernel,
        out_shape=jax.ShapeDtypeStruct((b_pad, n_pad), out_dtype),
        grid=grid,
        in_specs=[
            pl.BlockSpec((tb, in_features), lambda j, i: (i, 0)),   # x  (bf16, s-scaled)
            pl.BlockSpec((in_features, tn), lambda j, i: (0, j)),   # W^T (bf16, normalized)
            pl.BlockSpec((tb, 1), lambda j, i: (i, 0)),             # labels
        ],
        out_specs=pl.BlockSpec((tb, tn), lambda j, i: (i, j)),
        compiler_params=pltpu.CompilerParams(
            dimension_semantics=("parallel", "arbitrary"),
            vmem_limit_bytes=vmem_limit),
    )(x_bf, w_t, label2d)

    return out[:B, :out_features]


def xavier_uniform(key, out_features, in_features):
    # nn.init.xavier_uniform_: U(-a, a), a = sqrt(6 / (fan_in + fan_out))
    bound = math.sqrt(6.0 / (in_features + out_features))
    return jax.random.uniform(
        key, (out_features, in_features), dtype=jnp.float32,
        minval=-bound, maxval=bound)


if __name__ == "__main__":
    key = jax.random.PRNGKey(0)
    k_x, k_w, k_l = jax.random.split(key, 3)

    B = 8
    in_features = 48
    out_features = 200   # not a multiple of 128 -> exercises class-dim padding

    x = jax.random.normal(k_x, (B, in_features), dtype=jnp.float32)
    weight = xavier_uniform(k_w, out_features, in_features)
    label = jax.random.randint(k_l, (B,), 0, out_features, dtype=jnp.int32)

    out = arcface_forward(x, weight, label, s=64.0, m=0.2, easy_margin=False)
    jax.block_until_ready(out)

    # Pure-JAX reference matching the kernel's bf16-operand / f32-accumulate matmul
    # path (margin math in f32, one-hot blend as in the PyTorch module).
    def ref(x, w, label, s=64.0, m=0.2):
        xn = x * jax.lax.rsqrt(
            jnp.maximum(jnp.sum(x * x, axis=-1, keepdims=True), _EPS * _EPS))
        wn = w * jax.lax.rsqrt(
            jnp.maximum(jnp.sum(w * w, axis=-1, keepdims=True), _EPS * _EPS))
        cosine = jax.lax.dot_general(
            xn.astype(jnp.bfloat16), wn.astype(jnp.bfloat16),
            dimension_numbers=(((1,), (1,)), ((), ())),
            preferred_element_type=jnp.float32)
        sine = jnp.sqrt(jnp.clip(1.0 - cosine * cosine, 0.0, 1.0))
        phi = cosine * math.cos(m) - sine * math.sin(m)
        phi = jnp.where(cosine > math.cos(math.pi - m), phi,
                        cosine - math.sin(math.pi - m) * m)
        one_hot = jax.nn.one_hot(label, w.shape[0], dtype=jnp.float32)
        return (one_hot * phi + (1.0 - one_hot) * cosine) * s

    expected = ref(x, weight, label)
    assert out.shape == expected.shape
    max_err = float(jnp.max(jnp.abs(out - expected)))
    assert jnp.allclose(out, expected, atol=0.15, rtol=1e-3), max_err

    print("KERNEL_OK")
</pallas_src>

<mosaic_0001>
module attributes {stable_mosaic.version = 11 : i64} {
  func.func @arcface_kernel(%arg0: i32, %arg1: i32, %arg2: memref<8x48xbf16, #tpu.memory_space<vmem>>, %arg3: memref<48x256xbf16, #tpu.memory_space<vmem>>, %arg4: memref<8x1xi32, #tpu.memory_space<vmem>>, %arg5: memref<8x256xf32, #tpu.memory_space<vmem>>) attributes {dimension_semantics = [#tpu.dimension_semantics<parallel>, #tpu.dimension_semantics<arbitrary>], iteration_bounds = array<i64: 1, 1>, scalar_prefetch = 0 : i64, scratch_operands = 0 : i64, tpu.core_type = #tpu.core_type<tc>, window_params = [{transform_indices = @transform_0, window_bounds = array<i64: 8, 48>}, {transform_indices = @transform_1, window_bounds = array<i64: 48, 256>}, {transform_indices = @transform_2, window_bounds = array<i64: 8, 1>}, {transform_indices = @transform_3, window_bounds = array<i64: 8, 256>}]} {
    %c0 = arith.constant 0 : index
    %c0_0 = arith.constant 0 : index
    %0 = vector.load %arg2[%c0, %c0_0] : memref<8x48xbf16, #tpu.memory_space<vmem>>, vector<8x48xbf16>
    %c0_1 = arith.constant 0 : index
    %c0_2 = arith.constant 0 : index
    %1 = vector.load %arg3[%c0_1, %c0_2] : memref<48x256xbf16, #tpu.memory_space<vmem>>, vector<48x256xbf16>
    %cst = arith.constant dense<0.000000e+00> : vector<8x256xf32>
    %2 = tpu.matmul %0, %1, %cst {dimension_numbers = #tpu.dot_dimension_numbers<[1], [0], [0], [1], [0, 0, 1, 1], [], []>} : vector<8x48xbf16>, vector<48x256xbf16>, vector<8x256xf32> -> vector<8x256xf32>
    %c0_3 = arith.constant 0 : index
    %c0_4 = arith.constant 0 : index
    %3 = vector.load %arg4[%c0_3, %c0_4] : memref<8x1xi32, #tpu.memory_space<vmem>>, vector<8x1xi32>
    %c256_i32 = arith.constant 256 : i32
    %4 = arith.muli %arg0, %c256_i32 : i32
    %5 = vector.broadcast %4 : i32 to vector<8x1xi32>
    %6 = arith.subi %3, %5 : vector<8x1xi32>
    %7 = tpu.iota {dimensions = array<i32: 1>} : vector<8x256xi32>
    %8 = vector.broadcast %6 : vector<8x1xi32> to vector<8x256xi32>
    %9 = arith.cmpi eq, %7, %8 : vector<8x256xi32>
    %cst_5 = arith.constant -1.280000e+02 : f32
    %10 = vector.broadcast %cst_5 : f32 to vector<8x256xf32>
    %11 = arith.select %9, %2, %10 : vector<8x256xi1>, vector<8x256xf32>
    %cst_6 = arith.constant dense<0xFF800000> : vector<8xf32>
    %12 = vector.multi_reduction <maximumf>, %11, %cst_6 [1] : vector<8x256xf32> to vector<8xf32>
    %13 = vector.shape_cast %12 : vector<8xf32> to vector<8x1xf32>
    %cst_7 = arith.constant 1.562500e-02 : f32
    %14 = vector.broadcast %cst_7 : f32 to vector<8x1xf32>
    %15 = arith.mulf %13, %14 : vector<8x1xf32>
    %16 = arith.mulf %15, %15 : vector<8x1xf32>
    %cst_8 = arith.constant 1.000000e+00 : f32
    %17 = vector.broadcast %cst_8 : f32 to vector<8x1xf32>
    %18 = arith.subf %17, %16 : vector<8x1xf32>
    %cst_9 = arith.constant 0.000000e+00 : f32
    %cst_10 = arith.constant 1.000000e+00 : f32
    %19 = vector.broadcast %cst_9 : f32 to vector<8x1xf32>
    %20 = arith.maximumf %19, %18 : vector<8x1xf32>
    %21 = vector.broadcast %cst_10 : f32 to vector<8x1xf32>
    %22 = arith.minimumf %21, %20 : vector<8x1xf32>
    %23 = math.sqrt %22 : vector<8x1xf32>
    %cst_11 = arith.constant 0.980066597 : f32
    %24 = vector.broadcast %cst_11 : f32 to vector<8x1xf32>
    %25 = arith.mulf %15, %24 : vector<8x1xf32>
    %cst_12 = arith.constant 0.198669329 : f32
    %26 = vector.broadcast %cst_12 : f32 to vector<8x1xf32>
    %27 = arith.mulf %23, %26 : vector<8x1xf32>
    %28 = arith.subf %25, %27 : vector<8x1xf32>
    %cst_13 = arith.constant -0.980066597 : f32
    %29 = vector.broadcast %cst_13 : f32 to vector<8x1xf32>
    %30 = arith.cmpf ogt, %15, %29 : vector<8x1xf32>
    %cst_14 = arith.constant 0.0397338644 : f32
    %31 = vector.broadcast %cst_14 : f32 to vector<8x1xf32>
    %32 = arith.subf %15, %31 : vector<8x1xf32>
    %33 = arith.select %30, %28, %32 : vector<8x1xi1>, vector<8x1xf32>
    %cst_15 = arith.constant 6.400000e+01 : f32
    %34 = vector.broadcast %cst_15 : f32 to vector<8x1xf32>
    %35 = arith.mulf %33, %34 : vector<8x1xf32>
    %36 = vector.shape_cast %35 : vector<8x1xf32> to vector<8x1xf32>
    %37 = vector.broadcast %36 : vector<8x1xf32> to vector<8x256xf32>
    %38 = arith.select %9, %37, %2 : vector<8x256xi1>, vector<8x256xf32>
    %c0_16 = arith.constant 0 : index
    %c0_17 = arith.constant 0 : index
    %39 = vector.load %arg5[%c0_16, %c0_17] : memref<8x256xf32, #tpu.memory_space<vmem>>, vector<8x256xf32>
    tpu.vector_store %arg5[%c0_16, %c0_17], %38 {strides = array<i32>} : memref<8x256xf32, #tpu.memory_space<vmem>>, vector<8x256xf32>,
    return
  }
  func.func @transform_0(%arg0: i32, %arg1: i32) -> (i32, i32) {
    %c0_i32 = arith.constant 0 : i32
    %c0_i32_0 = arith.constant 0 : i32
    return %arg1, %c0_i32 : i32, i32
  }
  func.func @transform_1(%arg0: i32, %arg1: i32) -> (i32, i32) {
    %c0_i32 = arith.constant 0 : i32
    %c0_i32_0 = arith.constant 0 : i32
    return %c0_i32, %arg0 : i32, i32
  }
  func.func @transform_2(%arg0: i32, %arg1: i32) -> (i32, i32) {
    %c0_i32 = arith.constant 0 : i32
    %c0_i32_0 = arith.constant 0 : i32
    return %arg1, %c0_i32 : i32, i32
  }
  func.func @transform_3(%arg0: i32, %arg1: i32) -> (i32, i32) {
    %c0_i32 = arith.constant 0 : i32
    return %arg1, %arg0 : i32, i32
  }
}

</mosaic_0001>

<bundles_post_ra>
// kernel: tpu_custom_call.1
= control target key start
LH: loop header
LB: loop body
LE: loop exit
PB: predicated region body
PF: predicated region fallthrough
CT: control target
= control target key end

     0   :  { %8 = vsyncpa [#allocation3], 0  ;;  %s299_s0 = inlined_call_operand.vmem [shape: bf16[8,48], index: 0, kind: input, shape index: {}]   ;;  %s300_s1 = inlined_call_operand.hbm [shape: bf16[48,256], index: 1, kind: input, shape index: {}]   ;;  %s301_s2 = inlined_call_operand.vmem [shape: s32[8,1], index: 2, kind: input, shape index: {}]   ;;  %s302_s3 = inlined_call_operand.hbm [shape: f32[8,256], index: 3, kind: output, shape index: {}]  }
   0x1   :  { %9 = vsyncpa [#allocation4], 0  ;;  %s240_s12 = smov [#allocation2]   ;;  %s192_s16 = scalar_lea.hbm %s300_s1, 768 }
   0x2   :  { %s17_s13 = sshll.u32 %s240_s12, 4  ;;  %p193_p0 = scmp.ne.s32.totalorder %s300_s1, %s192_s16  ;;  %s18_s13 = int_to_ptr.vmem [resolvable:$true] %s17_s13 }
   0x3   :  { %p196_p1 = scmp.lt.u32.totalorder %s192_s16, %s300_s1 }
   0x5   :  { %p198_p2 = pnand %p196_p1, %p193_p0 }
   0x7   :  { %201 = shalt.err (!%p198_p2)
}
   0x8   :  { %s202_s21 = scalar_lea.vmem %s18_s13, 768  ;;  %p207_p4 = scmp.lt.s32.totalorder %s18_s13, %s18_s13 }
   0x9   :  { %p203_p3 = scmp.ne.s32.totalorder %s18_s13, %s202_s21  ;;  %p208_p5 = scmp.lt.s32.totalorder %s202_s21, %s202_s21 }
   0xb   :  { %p209_p6 = por %p208_p5, %p207_p4 }
   0xd   :  { %p210_p7 = pnand %p209_p6, %p203_p3 }
   0xf   :  { %213 = shalt.err (!%p210_p7)
}
  0x10   :  { %s241_s22 = smov 128   ;;  %s242_s23 = smov 8  }
  0x11   :  { %23 = dma.hbm_to_vmem [thread:$0]  %s300_s1, 768, %s18_s13, [#allocation3], %s241_s22, %s241_s22, %s242_s23  }
  0x12   :  { %236 = dma.done.wait [#allocation3], 768  }
  0x13   :  { %237 = vsyncadd [#allocation3], 4294966528  ;;  %v243_v0 = vmov 0   ;;  %v181_v1 = vld [vmem:[#allocation2 + $0x4] ss:$8 sps:$4 sm:$0xff]   ;;  %vm67_vm0 = vcmask 392192   ;;  %v116_v9 = vlaneseq }
  0x14   :  { %103 = vmatprep.mubr.bf16.mxu0 %v243_v0  ;;  %180 = vset.pattern.permute.xlu0 %v243_v0  ;;  %v183_v2 = vld [vmem:[#allocation2] ss:$8 sps:$4 sm:$0xff]   ;;  %v184_v3 = vld [vmem:[#allocation2 + $0x14] ss:$8 sps:$4 sm:$0xff]   ;;  %v186_v4 = vld [vmem:[#allocation2 + $0x10] ss:$8 sps:$4 sm:$0xff]  }
  0x15   :  { %71 = vmatprep.subr.bf16.mxu0 %v181_v1  ;;  %v187_v5 = vld [vmem:[#allocation2 + $0x24] ss:$8 sps:$4 sm:$0xff]   ;;  %v189_v7 = vld [vmem:[#allocation2 + $0x20] ss:$8 sps:$4 sm:$0xff]   ;;  %v117_v10 = vand.u32 127, %v116_v9 }
  0x16   :  { %72 = vmatpush1.bf16.msra.mxu0 %v183_v2  ;;  %v112_v6 = vld [vmem:[%s301_s2] sm:$0xff] }
  0x17   :  { %73 = vmatprep.subr.bf16.mxu0 %v184_v3  ;;  %120 = vperm.xlu0 %180, %v112_v6   ;;  %v30_v8 = vld [vmem:[%s299_s0] sm:$0xf]  ;;  %v118_v11 = vadd.s32 128, %v117_v10  ;;  %s244_s0 = smov [#allocation5]  }
  0x18   :  { %s158_s2 = sshll.u32 %s244_s0, 4  ;;  %s159_s2 = int_to_ptr.vmem [resolvable:$true] %s158_s2 }
  0x19   :  { %s214_s29 = scalar_lea.vmem %s159_s2, 256  ;;  %p219_p9 = scmp.lt.s32.totalorder %s159_s2, %s159_s2 }
  0x1a   :  { %74 = vmatpush1.bf16.msra.mxu0 %v186_v4  ;;  %p215_p8 = scmp.ne.s32.totalorder %s159_s2, %s214_s29  ;;  %p220_p10 = scmp.lt.s32.totalorder %s214_s29, %s214_s29 }
  0x1b   :  { %75 = vmatprep.subr.bf16.mxu0 %v187_v5 }
  0x1c   :  { %p221_p11 = por %p220_p10, %p219_p9 }
  0x1e   :  { %76 = vmatpush1.bf16.msra.mxu0 %v189_v7  ;;  %p222_p12 = pnand %p221_p11, %p215_p8 }
  0x21   :  { %173 = vmatmul.mubr.msk.bf16.vlgmr.msra.gmra.mrb[0].mxu0 %vm67_vm0, %v30_v8 }
  0x96   :  { %v121_v12 = vpop.permute.xlu0 %120 }
  0x97   :  { %vm122_vm1 = vcmp.eq.s32.totalorder %v117_v10, %v121_v12  ;;  %vm123_vm2 = vcmp.eq.s32.totalorder %v118_v11, %v121_v12 }
  0xf4   :  { %v105_v13 = vpop.f32.mrb[0].mxu0 }
  0xf5   :  { %v124_v14 = vsel %vm122_vm1, %v105_v13, -128.0  ;;  %v107_v15 = vpop.f32.mrb[1].mxu0 }
  0xf6   :  { %v125_v16 = vsel %vm123_vm2, %v107_v15, -128.0  ;;  %v109_v17 = vpop.f32.mrb[2].mxu0 }
  0xf7   :  { %v110_v18 = vpop.f32.mrb[3].mxu0  ;;  %v126_v19 = vmax.f32 %v124_v14, %v125_v16 }
  0xf9   :  { %127 = vmax.xlane.f32.xlu0 %v126_v19 }
 0x186   :  { %v128_v20 = vpop.xlane.xlu0 %127 }
 0x187   :  { %v129_v21 = vmul.f32 0.015625, %v128_v20 }
 0x189   :  { %v130_v22 = vmul.f32 %v129_v21, %v129_v21  ;;  %v141_v31 = vmul.f32 0.9800666, %v129_v21  ;;  %v174_v34 = vadd.f32 -0.039733864, %v129_v21  ;;  %vm144_vm5 = vcmp.gt.f32.partialorder %v129_v21, -0.9800666 }
 0x18b   :  { %v131_v23 = vsub.f32 1.0, %v130_v22 }
 0x18d   :  { %v132_v24 = vmax.f32 %v131_v23, 0.0 }
 0x18f   :  { %v133_v25 = vmin.f32 %v132_v24, 1.0 }
 0x191   :  { %190 = vrsqrt.f32 %v133_v25  ;;  %vm136_vm3 = vcmp.eq.f32.partialorder %v133_v25, inf  ;;  %v139_v28 = vand.u32 2147483648, %v133_v25  ;;  %vm138_vm4 = vcmp.eq.f32.partialorder %v133_v25, 0.0 }
 0x19b   :  { %v191_v26 = vpop.eup %190 }
 0x19c   :  { %v135_v27 = vmul.f32 %v191_v26, %v133_v25 }
 0x19e   :  { %v137_v29 = vsel %vm136_vm3, %v133_v25, %v135_v27 }
 0x19f   :  { %v140_v30 = vsel %vm138_vm4, %v139_v28, %v137_v29 }
 0x1a0   :  { %v142_v32 = vmul.f32 0.19866933, %v140_v30 }
 0x1a2   :  { %v143_v33 = vsub.f32 %v141_v31, %v142_v32 }
 0x1a4   :  { %v146_v35 = vsel %vm144_vm5, %v143_v33, %v174_v34 }
 0x1a5   :  { %v147_v36 = vmul.f32 64.0, %v146_v35 }
 0x1a7   :  { %v148_v37 = vsel %vm122_vm1, %v147_v36, %v105_v13  ;;  %v149_v38 = vsel %vm123_vm2, %v147_v36, %v107_v15 }
 0x1a8   :  { %150 = vst [vmem:[#allocation5] sm:$0xff] %v148_v37  ;;  %151 = vst [vmem:[#allocation5 + $0x8] sm:$0xff] %v149_v38 }
 0x1a9   :  { %225 = shalt.err (!%p222_p12)
}
 0x1aa   :  { %s226_s5 = scalar_lea.hbm %s302_s3, 256 }
 0x1ab   :  { %p227_p13 = scmp.ne.s32.totalorder %s302_s3, %s226_s5  ;;  %p230_p0 = scmp.lt.u32.totalorder %s226_s5, %s302_s3 }
 0x1ad   :  { %p232_p1 = pnand %p230_p0, %p227_p13 }
 0x1af   :  { %235 = shalt.err (!%p232_p1)
}
 0x1b0   :  { %161 = dma.vmem_to_hbm [thread:$0]  %s159_s2, 256, %s302_s3, [#allocation4]  }
 0x1b1   :  { %238 = dma.done.wait [#allocation4], 256  }
 0x1b2   :  { %239 = vsyncadd [#allocation4], 4294967040 }
 0x1b3   :  { %165 = vsyncpa [#allocation3], 1 }
 0x1b4   :  { %166 = vsyncpa [#allocation4], 1 }

</bundles_post_ra>
